<compile_context>
chip_gen: v5e
topology: v5e:2x2
jax: 0.10.0
libtpu: 0.0.40
codegen_flags: <defaults>
</compile_context>

<pallas_src>
import functools

import jax
import jax.numpy as jnp
from jax import lax
from jax.experimental import pallas as pl
from jax.experimental.pallas import tpu as pltpu


def _round_up(x, m):
    return (x + m - 1) // m * m


# ----------------------------------------------------------------------------
# Parameter setup (mirrors PyTorch weight_norm(Conv2d) reparametrization).
# The effective weight is repacked as a single (cout_p, k*k*cin_p) bf16 matrix so
# each layer is one fused im2col GEMM on the MXU; bias stays f32 as (cout_p, 1).
# ----------------------------------------------------------------------------
def _prep_kernel_weights(w, b, cin_p, cout_p):
    cout, cin, k, _ = w.shape
    wt = jnp.transpose(w, (2, 3, 1, 0))                                  # (kh, kw, cin, cout)
    wt = jnp.pad(wt, ((0, 0), (0, 0), (0, cin_p - cin), (0, cout_p - cout)))
    w_k = wt.reshape(k * k * cin_p, cout_p).T.astype(jnp.bfloat16)       # (cout_p, K)
    b_k = jnp.pad(b, (0, cout_p - cout)).reshape(cout_p, 1)              # (cout_p, 1) f32
    return w_k, b_k


def init_temporal_convnet2d(key, in_channels, out_channels, kernel_size=2):
    assert out_channels % 4 == 0
    chans = [in_channels, out_channels // 4, out_channels // 3,
             out_channels // 2, out_channels]
    keys = jax.random.split(key, 4)
    params = []
    for l in range(4):
        cin, cout = chans[l], chans[l + 1]
        kv, kg, kb = jax.random.split(keys[l], 3)
        v = jax.random.normal(kv, (cout, cin, kernel_size, kernel_size),
                              jnp.float32) * 0.1
        g = jax.random.uniform(kg, (cout,), jnp.float32, 0.5, 1.5)
        b = jax.random.uniform(kb, (cout,), jnp.float32, -0.1, 0.1)
        norm = jnp.sqrt(jnp.sum(v * v, axis=(1, 2, 3), keepdims=True))
        w = g[:, None, None, None] * v / norm                            # weight_norm(dim=0)
        cin_p, cout_p = _round_up(cin, 8), _round_up(cout, 8)
        w_k, b_k = _prep_kernel_weights(w, b, cin_p, cout_p)
        params.append({"w": w, "b": b, "w_k": w_k, "b_k": b_k})
    return params


# ----------------------------------------------------------------------------
# Fused forward pass (single pallas_call, single grid step)
# ----------------------------------------------------------------------------
@functools.partial(jax.jit, static_argnames=("stride", "base_dilation"))
def temporal_convnet2d_forward(x, params, stride=1, base_dilation=1):
    N, Cin, H, W = x.shape
    k = params[0]["w"].shape[-1]
    chans = [params[0]["w"].shape[1]] + [p["w"].shape[0] for p in params]
    assert Cin == chans[0]
    strides = [stride, stride, stride * 2, stride * 2]
    dilations = [base_dilation * i for i in (1, 2, 3, 4)]

    # ---- static geometry (deferred strides, flattened lane-major spatial) ----
    R = H * W                                  # lanes per sample block
    layers = []
    S = 1                                      # cumulative (deferred) stride
    Hf, Wf = H, W                              # full-resolution activation sizes
    for l in range(4):
        cin_p, cout_p = _round_up(chans[l], 8), _round_up(chans[l + 1], 8)
        D = dilations[l] * S                   # effective dilation on the full grid
        Hf_o, Wf_o = Hf - D * (k - 1), Wf - D * (k - 1)
        assert Hf_o >= 1 and Wf_o >= 1, "input spatially too small for this net"
        valid_in = (N - 1) * R + Hf * W        # lanes holding this layer's input
        M2 = Hf_o * W                          # per-sample output lanes
        MT = (N - 1) * R + M2                  # total output lanes computed
        L_in = _round_up(valid_in + (k - 1) * D, 128)   # input-buffer lane alloc
        layers.append(dict(cin_p=cin_p, cout_p=cout_p, K=k * k * cin_p, D=D,
                           Hf_in=Hf, Hf_out=Hf_o, Wf_out=Wf_o,
                           valid_in=valid_in, M2=M2, MT=MT, L_in=L_in))
        S *= strides[l]
        Hf, Wf = Hf_o, Wf_o
    Ho, Wo = (Hf - 1) // S + 1, (Wf - 1) // S + 1          # true (strided) output size

    cin_p0, L0 = layers[0]["cin_p"], layers[0]["L_in"]
    cout_pL, MT_L = layers[-1]["cout_p"], layers[-1]["MT"]
    K_max = max(lay["K"] for lay in layers)
    MT_max = _round_up(max(lay["MT"] for lay in layers), 128)

    # ---- the fused kernel ----------------------------------------------------
    # Correctness invariant (documented per review): tap reads wrap across spatial
    # rows / sample blocks for "garbage" output columns (w >= Wf_out etc.).  Valid
    # output positions provably only ever read valid input positions, so garbage
    # never propagates into valid data and is cropped in the wrapper.
    def kernel(x_ref, w0, b0, w1, b1, w2, b2, w3, b3, out_ref, a1, a2, a3, slab):
        acts = (x_ref, a1, a2, a3)             # (cin_p, lanes) activation buffers
        ws = (w0, w1, w2, w3)
        bs = (b0, b1, b2, b3)

        # Zero only the few uninitialized tail lanes of each intermediate buffer
        # (past what the previous layer writes, inside what the next layer's tap
        # windows may touch).  Keeps garbage columns NaN-free; valid outputs never
        # read these lanes.
        for l in range(1, 4):
            lay = layers[l]
            v, L = lay["valid_in"], lay["L_in"]
            acts[l][:, v:L] = jnp.zeros((lay["cin_p"], L - v), jnp.float32)

        for l in range(4):
            lay = layers[l]
            D, MT, cin_p, K = lay["D"], lay["MT"], lay["cin_p"], lay["K"]
            src = acts[l]
            # In-VMEM im2col: one contiguous (K, MT) slab -> ONE MXU GEMM per layer
            # (K = k*k*cin_p instead of k*k separate lane-sparse K=cin_p matmuls).
            for ki in range(k):
                for kj in range(k):
                    t = ki * k + kj
                    off = ki * D * W + kj * D
                    slab[t * cin_p:(t + 1) * cin_p, 0:MT] = src[:, off:off + MT]
            y = jnp.dot(ws[l][...],                              # (cout_p, K)  bf16
                        slab[0:K, 0:MT].astype(jnp.bfloat16),    # (K, MT)      bf16
                        preferred_element_type=jnp.float32)      # f32 accumulate
            y = y + bs[l][...]                                   # (cout_p, MT) f32
            y = jnp.maximum(y, jnp.float32(0.1) * y)             # LeakyReLU(0.1)
            # TODO(synk): Dropout is identity here (eval mode); training-mode
            # stochastic masking is not implemented.
            if l + 1 < 4:
                acts[l + 1][:, 0:MT] = y
            else:
                out_ref[...] = y.astype(out_ref.dtype)

    # ---- specs / scratch -----------------------------------------------------
    in_specs = [pl.BlockSpec((cin_p0, L0), lambda i: (0, 0))]
    for lay in layers:
        in_specs.append(pl.BlockSpec((lay["cout_p"], lay["K"]), lambda i: (0, 0)))
        in_specs.append(pl.BlockSpec((lay["cout_p"], 1), lambda i: (0, 0)))
    out_specs = pl.BlockSpec((cout_pL, MT_L), lambda i: (0, 0))
    out_shape = jax.ShapeDtypeStruct((cout_pL, MT_L), jnp.float32)

    scratch = [pltpu.VMEM((layers[l]["cin_p"], layers[l]["L_in"]), jnp.float32)
               for l in range(1, 4)]
    scratch.append(pltpu.VMEM((K_max, MT_max), jnp.float32))     # shared im2col slab

    # VMEM budget guard (deferred-stride buffers are full resolution; v7x = 64 MiB/TC).
    vmem_needed = (4 * cin_p0 * L0 + 4 * cout_pL * MT_L
                   + sum(4 * layers[l]["cin_p"] * layers[l]["L_in"] for l in range(1, 4))
                   + 4 * K_max * MT_max
                   + sum(2 * lay["cout_p"] * lay["K"] + 4 * lay["cout_p"] for lay in layers))
    assert vmem_needed < 40 * (1 << 20), f"VMEM footprint too large: {vmem_needed} B"

    flops = 2 * sum(lay["cout_p"] * lay["K"] * lay["MT"] for lay in layers)
    bytes_accessed = (4 * cin_p0 * L0 + 4 * cout_pL * MT_L
                      + sum(2 * lay["cout_p"] * lay["K"] + 4 * lay["cout_p"]
                            for lay in layers))
    cost = pl.CostEstimate(flops=flops, transcendentals=0,
                           bytes_accessed=bytes_accessed)

    # ---- entry glue (once, in HBM): NCHW -> (channels, N*H*W), pad to buffer ---
    xt = jnp.transpose(x, (1, 0, 2, 3)).reshape(Cin, N * R)
    xin = jnp.pad(xt, ((0, cin_p0 - Cin), (0, L0 - N * R)))

    flat_wb = []
    for p in params:
        flat_wb += [p["w_k"], p["b_k"]]

    out_flat = pl.pallas_call(
        kernel,
        out_shape=out_shape,
        grid=(1,),
        in_specs=in_specs,
        out_specs=out_specs,
        scratch_shapes=scratch,
        compiler_params=pltpu.CompilerParams(
            dimension_semantics=("arbitrary",)),
        cost_estimate=cost,
    )(xin, *flat_wb)

    # ---- exit glue (once): un-flatten, apply the deferred stride, crop, NCHW ---
    M2L, HfL = layers[-1]["M2"], layers[-1]["Hf_out"]
    y = jnp.stack([out_flat[:, n * R:n * R + M2L] for n in range(N)], axis=0)
    y = y.reshape(N, cout_pL, HfL, W)
    y = y[:, :chans[-1], :(Ho - 1) * S + 1:S, :(Wo - 1) * S + 1:S]
    return y


# ----------------------------------------------------------------------------
# Pure-JAX reference (lax conv with real strides/dilations, f32) for correctness
# ----------------------------------------------------------------------------
def _reference_forward(x, params, stride=1, base_dilation=1):
    strides = [stride, stride, stride * 2, stride * 2]
    dilations = [base_dilation * i for i in (1, 2, 3, 4)]
    for p, s, d in zip(params, strides, dilations):
        y = lax.conv_general_dilated(
            x, p["w"], window_strides=(s, s), padding="VALID",
            rhs_dilation=(d, d),
            dimension_numbers=("NCHW", "OIHW", "NCHW"),
            precision=lax.Precision.HIGHEST,
        ) + p["b"][None, :, None, None]
        x = jnp.where(y > 0, y, 0.1 * y)
    return x


if __name__ == "__main__":
    key = jax.random.PRNGKey(0)
    k_param, k_x = jax.random.split(key)

    in_channels, out_channels = 4, 32
    N, H, W = 2, 16, 16
    params = init_temporal_convnet2d(k_param, in_channels, out_channels,
                                     kernel_size=2)

    # Input: (N=2, C=4, H=16, W=16) NCHW, matching the PyTorch module.
    x = jax.random.normal(k_x, (N, in_channels, H, W), jnp.float32)

    out = temporal_convnet2d_forward(x, params, stride=1, base_dilation=1)
    out = jax.block_until_ready(out)

    ref = _reference_forward(x, params, stride=1, base_dilation=1)
    assert out.shape == ref.shape == (N, out_channels, 1, 1), (out.shape, ref.shape)
    # bf16 MXU operands (requested by the perf review for all three generations)
    # bound the accumulated error after 4 layers to ~1e-2; accumulation and all
    # elementwise math stay f32.
    max_err = float(jnp.max(jnp.abs(out - ref)))
    assert jnp.allclose(out, ref, atol=3e-2, rtol=3e-2), max_err

    print("KERNEL_OK")
</pallas_src>

<mosaic_0001>
module attributes {stable_mosaic.version = 11 : i64} {
  func.func @kernel(%arg0: i32, %arg1: memref<8x640xf32, #tpu.memory_space<vmem>>, %arg2: memref<8x32xbf16, #tpu.memory_space<vmem>>, %arg3: memref<8x1xf32, #tpu.memory_space<vmem>>, %arg4: memref<16x32xbf16, #tpu.memory_space<vmem>>, %arg5: memref<16x1xf32, #tpu.memory_space<vmem>>, %arg6: memref<16x64xbf16, #tpu.memory_space<vmem>>, %arg7: memref<16x1xf32, #tpu.memory_space<vmem>>, %arg8: memref<32x64xbf16, #tpu.memory_space<vmem>>, %arg9: memref<32x1xf32, #tpu.memory_space<vmem>>, %arg10: memref<32x288xf32, #tpu.memory_space<vmem>>, %arg11: memref<8x512xf32, #tpu.memory_space<vmem>>, %arg12: memref<16x512xf32, #tpu.memory_space<vmem>>, %arg13: memref<16x512xf32, #tpu.memory_space<vmem>>, %arg14: memref<64x512xf32, #tpu.memory_space<vmem>>) attributes {dimension_semantics = [#tpu.dimension_semantics<arbitrary>], iteration_bounds = array<i64: 1>, scalar_prefetch = 0 : i64, scratch_operands = 4 : i64, tpu.core_type = #tpu.core_type<tc>, window_params = [{pipeline_mode = #tpu.pipeline_mode<synchronous>, transform_indices = @transform_0, window_bounds = array<i64: 8, 640>}, {pipeline_mode = #tpu.pipeline_mode<synchronous>, transform_indices = @transform_1, window_bounds = array<i64: 8, 32>}, {pipeline_mode = #tpu.pipeline_mode<synchronous>, transform_indices = @transform_2, window_bounds = array<i64: 8, 1>}, {pipeline_mode = #tpu.pipeline_mode<synchronous>, transform_indices = @transform_3, window_bounds = array<i64: 16, 32>}, {pipeline_mode = #tpu.pipeline_mode<synchronous>, transform_indices = @transform_4, window_bounds = array<i64: 16, 1>}, {pipeline_mode = #tpu.pipeline_mode<synchronous>, transform_indices = @transform_5, window_bounds = array<i64: 16, 64>}, {pipeline_mode = #tpu.pipeline_mode<synchronous>, transform_indices = @transform_6, window_bounds = array<i64: 16, 1>}, {pipeline_mode = #tpu.pipeline_mode<synchronous>, transform_indices = @transform_7, window_bounds = array<i64: 32, 64>}, {pipeline_mode = #tpu.pipeline_mode<synchronous>, transform_indices = @transform_8, window_bounds = array<i64: 32, 1>}, {pipeline_mode = #tpu.pipeline_mode<synchronous>, transform_indices = @transform_9, window_bounds = array<i64: 32, 288>}]} {
    %cst = arith.constant 0.000000e+00 : f32
    %0 = vector.broadcast %cst : f32 to vector<8x16xf32>
    %c0 = arith.constant 0 : index
    %c496 = arith.constant 496 : index
    %1 = vector.load %arg11[%c0, %c496] : memref<8x512xf32, #tpu.memory_space<vmem>>, vector<8x16xf32>
    tpu.vector_store %arg11[%c0, %c496], %0 {strides = array<i32>} : memref<8x512xf32, #tpu.memory_space<vmem>>, vector<8x16xf32>,
    %cst_0 = arith.constant 0.000000e+00 : f32
    %2 = vector.broadcast %cst_0 : f32 to vector<16x48xf32>
    %c0_1 = arith.constant 0 : index
    %c464 = arith.constant 464 : index
    %3 = vector.load %arg12[%c0_1, %c464] : memref<16x512xf32, #tpu.memory_space<vmem>>, vector<16x48xf32>
    tpu.vector_store %arg12[%c0_1, %c464], %2 {strides = array<i32>} : memref<16x512xf32, #tpu.memory_space<vmem>>, vector<16x48xf32>,
    %cst_2 = arith.constant 0.000000e+00 : f32
    %4 = vector.broadcast %cst_2 : f32 to vector<16x96xf32>
    %c0_3 = arith.constant 0 : index
    %c416 = arith.constant 416 : index
    %5 = vector.load %arg13[%c0_3, %c416] : memref<16x512xf32, #tpu.memory_space<vmem>>, vector<16x96xf32>
    tpu.vector_store %arg13[%c0_3, %c416], %4 {strides = array<i32>} : memref<16x512xf32, #tpu.memory_space<vmem>>, vector<16x96xf32>,
    %c0_4 = arith.constant 0 : index
    %c0_5 = arith.constant 0 : index
    %6 = vector.load %arg1[%c0_4, %c0_5] : memref<8x640xf32, #tpu.memory_space<vmem>>, vector<8x496xf32>
    %c0_6 = arith.constant 0 : index
    %c0_7 = arith.constant 0 : index
    %7 = vector.load %arg14[%c0_6, %c0_7] : memref<64x512xf32, #tpu.memory_space<vmem>>, vector<8x496xf32>
    tpu.vector_store %arg14[%c0_6, %c0_7], %6 {strides = array<i32>} : memref<64x512xf32, #tpu.memory_space<vmem>>, vector<8x496xf32>,
    %c0_8 = arith.constant 0 : index
    %c1 = arith.constant 1 : index
    %8 = vector.load %arg1[%c0_8, %c1] : memref<8x640xf32, #tpu.memory_space<vmem>>, vector<8x496xf32>
    %c8 = arith.constant 8 : index
    %c0_9 = arith.constant 0 : index
    %9 = vector.load %arg14[%c8, %c0_9] : memref<64x512xf32, #tpu.memory_space<vmem>>, vector<8x496xf32>
    tpu.vector_store %arg14[%c8, %c0_9], %8 {strides = array<i32>} : memref<64x512xf32, #tpu.memory_space<vmem>>, vector<8x496xf32>,
    %c0_10 = arith.constant 0 : index
    %c16 = arith.constant 16 : index
    %10 = vector.load %arg1[%c0_10, %c16] : memref<8x640xf32, #tpu.memory_space<vmem>>, vector<8x496xf32>
    %c16_11 = arith.constant 16 : index
    %c0_12 = arith.constant 0 : index
    %11 = vector.load %arg14[%c16_11, %c0_12] : memref<64x512xf32, #tpu.memory_space<vmem>>, vector<8x496xf32>
    tpu.vector_store %arg14[%c16_11, %c0_12], %10 {strides = array<i32>} : memref<64x512xf32, #tpu.memory_space<vmem>>, vector<8x496xf32>,
    %c0_13 = arith.constant 0 : index
    %c17 = arith.constant 17 : index
    %12 = vector.load %arg1[%c0_13, %c17] : memref<8x640xf32, #tpu.memory_space<vmem>>, vector<8x496xf32>
    %c24 = arith.constant 24 : index
    %c0_14 = arith.constant 0 : index
    %13 = vector.load %arg14[%c24, %c0_14] : memref<64x512xf32, #tpu.memory_space<vmem>>, vector<8x496xf32>
    tpu.vector_store %arg14[%c24, %c0_14], %12 {strides = array<i32>} : memref<64x512xf32, #tpu.memory_space<vmem>>, vector<8x496xf32>,
    %c0_15 = arith.constant 0 : index
    %c0_16 = arith.constant 0 : index
    %14 = vector.load %arg2[%c0_15, %c0_16] : memref<8x32xbf16, #tpu.memory_space<vmem>>, vector<8x32xbf16>
    %c0_17 = arith.constant 0 : index
    %c0_18 = arith.constant 0 : index
    %15 = vector.load %arg14[%c0_17, %c0_18] : memref<64x512xf32, #tpu.memory_space<vmem>>, vector<32x496xf32>
    %16 = arith.truncf %15 : vector<32x496xf32> to vector<32x496xbf16>
    %cst_19 = arith.constant dense<0.000000e+00> : vector<8x496xf32>
    %17 = tpu.matmul %14, %16, %cst_19 {dimension_numbers = #tpu.dot_dimension_numbers<[1], [0], [0], [1], [0, 0, 1, 1], [], []>} : vector<8x32xbf16>, vector<32x496xbf16>, vector<8x496xf32> -> vector<8x496xf32>
    %c0_20 = arith.constant 0 : index
    %c0_21 = arith.constant 0 : index
    %18 = vector.load %arg3[%c0_20, %c0_21] : memref<8x1xf32, #tpu.memory_space<vmem>>, vector<8x1xf32>
    %19 = vector.broadcast %18 : vector<8x1xf32> to vector<8x496xf32>
    %20 = arith.addf %17, %19 : vector<8x496xf32>
    %cst_22 = arith.constant 1.000000e-01 : f32
    %21 = vector.broadcast %cst_22 : f32 to vector<8x496xf32>
    %22 = arith.mulf %21, %20 : vector<8x496xf32>
    %23 = arith.maximumf %20, %22 : vector<8x496xf32>
    %c0_23 = arith.constant 0 : index
    %c0_24 = arith.constant 0 : index
    %24 = vector.load %arg11[%c0_23, %c0_24] : memref<8x512xf32, #tpu.memory_space<vmem>>, vector<8x496xf32>
    tpu.vector_store %arg11[%c0_23, %c0_24], %23 {strides = array<i32>} : memref<8x512xf32, #tpu.memory_space<vmem>>, vector<8x496xf32>,
    %c0_25 = arith.constant 0 : index
    %c0_26 = arith.constant 0 : index
    %25 = vector.load %arg11[%c0_25, %c0_26] : memref<8x512xf32, #tpu.memory_space<vmem>>, vector<8x464xf32>
    %c0_27 = arith.constant 0 : index
    %c0_28 = arith.constant 0 : index
    %26 = vector.load %arg14[%c0_27, %c0_28] : memref<64x512xf32, #tpu.memory_space<vmem>>, vector<8x464xf32>
    tpu.vector_store %arg14[%c0_27, %c0_28], %25 {strides = array<i32>} : memref<64x512xf32, #tpu.memory_space<vmem>>, vector<8x464xf32>,
    %c0_29 = arith.constant 0 : index
    %c2 = arith.constant 2 : index
    %27 = vector.load %arg11[%c0_29, %c2] : memref<8x512xf32, #tpu.memory_space<vmem>>, vector<8x464xf32>
    %c8_30 = arith.constant 8 : index
    %c0_31 = arith.constant 0 : index
    %28 = vector.load %arg14[%c8_30, %c0_31] : memref<64x512xf32, #tpu.memory_space<vmem>>, vector<8x464xf32>
    tpu.vector_store %arg14[%c8_30, %c0_31], %27 {strides = array<i32>} : memref<64x512xf32, #tpu.memory_space<vmem>>, vector<8x464xf32>,
    %c0_32 = arith.constant 0 : index
    %c32 = arith.constant 32 : index
    %29 = vector.load %arg11[%c0_32, %c32] : memref<8x512xf32, #tpu.memory_space<vmem>>, vector<8x464xf32>
    %c16_33 = arith.constant 16 : index
    %c0_34 = arith.constant 0 : index
    %30 = vector.load %arg14[%c16_33, %c0_34] : memref<64x512xf32, #tpu.memory_space<vmem>>, vector<8x464xf32>
    tpu.vector_store %arg14[%c16_33, %c0_34], %29 {strides = array<i32>} : memref<64x512xf32, #tpu.memory_space<vmem>>, vector<8x464xf32>,
    %c0_35 = arith.constant 0 : index
    %c34 = arith.constant 34 : index
    %31 = vector.load %arg11[%c0_35, %c34] : memref<8x512xf32, #tpu.memory_space<vmem>>, vector<8x464xf32>
    %c24_36 = arith.constant 24 : index
    %c0_37 = arith.constant 0 : index
    %32 = vector.load %arg14[%c24_36, %c0_37] : memref<64x512xf32, #tpu.memory_space<vmem>>, vector<8x464xf32>
    tpu.vector_store %arg14[%c24_36, %c0_37], %31 {strides = array<i32>} : memref<64x512xf32, #tpu.memory_space<vmem>>, vector<8x464xf32>,
    %c0_38 = arith.constant 0 : index
    %c0_39 = arith.constant 0 : index
    %33 = vector.load %arg4[%c0_38, %c0_39] : memref<16x32xbf16, #tpu.memory_space<vmem>>, vector<16x32xbf16>
    %c0_40 = arith.constant 0 : index
    %c0_41 = arith.constant 0 : index
    %34 = vector.load %arg14[%c0_40, %c0_41] : memref<64x512xf32, #tpu.memory_space<vmem>>, vector<32x464xf32>
    %35 = arith.truncf %34 : vector<32x464xf32> to vector<32x464xbf16>
    %cst_42 = arith.constant dense<0.000000e+00> : vector<16x464xf32>
    %36 = tpu.matmul %33, %35, %cst_42 {dimension_numbers = #tpu.dot_dimension_numbers<[1], [0], [0], [1], [0, 0, 1, 1], [], []>} : vector<16x32xbf16>, vector<32x464xbf16>, vector<16x464xf32> -> vector<16x464xf32>
    %c0_43 = arith.constant 0 : index
    %c0_44 = arith.constant 0 : index
    %37 = vector.load %arg5[%c0_43, %c0_44] : memref<16x1xf32, #tpu.memory_space<vmem>>, vector<16x1xf32>
    %38 = vector.broadcast %37 : vector<16x1xf32> to vector<16x464xf32>
    %39 = arith.addf %36, %38 : vector<16x464xf32>
    %cst_45 = arith.constant 1.000000e-01 : f32
    %40 = vector.broadcast %cst_45 : f32 to vector<16x464xf32>
    %41 = arith.mulf %40, %39 : vector<16x464xf32>
    %42 = arith.maximumf %39, %41 : vector<16x464xf32>
    %c0_46 = arith.constant 0 : index
    %c0_47 = arith.constant 0 : index
    %43 = vector.load %arg12[%c0_46, %c0_47] : memref<16x512xf32, #tpu.memory_space<vmem>>, vector<16x464xf32>
    tpu.vector_store %arg12[%c0_46, %c0_47], %42 {strides = array<i32>} : memref<16x512xf32, #tpu.memory_space<vmem>>, vector<16x464xf32>,
    %c0_48 = arith.constant 0 : index
    %c0_49 = arith.constant 0 : index
    %44 = vector.load %arg12[%c0_48, %c0_49] : memref<16x512xf32, #tpu.memory_space<vmem>>, vector<16x416xf32>
    %c0_50 = arith.constant 0 : index
    %c0_51 = arith.constant 0 : index
    %45 = vector.load %arg14[%c0_50, %c0_51] : memref<64x512xf32, #tpu.memory_space<vmem>>, vector<16x416xf32>
    tpu.vector_store %arg14[%c0_50, %c0_51], %44 {strides = array<i32>} : memref<64x512xf32, #tpu.memory_space<vmem>>, vector<16x416xf32>,
    %c0_52 = arith.constant 0 : index
    %c3 = arith.constant 3 : index
    %46 = vector.load %arg12[%c0_52, %c3] : memref<16x512xf32, #tpu.memory_space<vmem>>, vector<16x416xf32>
    %c16_53 = arith.constant 16 : index
    %c0_54 = arith.constant 0 : index
    %47 = vector.load %arg14[%c16_53, %c0_54] : memref<64x512xf32, #tpu.memory_space<vmem>>, vector<16x416xf32>
    tpu.vector_store %arg14[%c16_53, %c0_54], %46 {strides = array<i32>} : memref<64x512xf32, #tpu.memory_space<vmem>>, vector<16x416xf32>,
    %c0_55 = arith.constant 0 : index
    %c48 = arith.constant 48 : index
    %48 = vector.load %arg12[%c0_55, %c48] : memref<16x512xf32, #tpu.memory_space<vmem>>, vector<16x416xf32>
    %c32_56 = arith.constant 32 : index
    %c0_57 = arith.constant 0 : index
    %49 = vector.load %arg14[%c32_56, %c0_57] : memref<64x512xf32, #tpu.memory_space<vmem>>, vector<16x416xf32>
    tpu.vector_store %arg14[%c32_56, %c0_57], %48 {strides = array<i32>} : memref<64x512xf32, #tpu.memory_space<vmem>>, vector<16x416xf32>,
    %c0_58 = arith.constant 0 : index
    %c51 = arith.constant 51 : index
    %50 = vector.load %arg12[%c0_58, %c51] : memref<16x512xf32, #tpu.memory_space<vmem>>, vector<16x416xf32>
    %c48_59 = arith.constant 48 : index
    %c0_60 = arith.constant 0 : index
    %51 = vector.load %arg14[%c48_59, %c0_60] : memref<64x512xf32, #tpu.memory_space<vmem>>, vector<16x416xf32>
    tpu.vector_store %arg14[%c48_59, %c0_60], %50 {strides = array<i32>} : memref<64x512xf32, #tpu.memory_space<vmem>>, vector<16x416xf32>,
    %c0_61 = arith.constant 0 : index
    %c0_62 = arith.constant 0 : index
    %52 = vector.load %arg6[%c0_61, %c0_62] : memref<16x64xbf16, #tpu.memory_space<vmem>>, vector<16x64xbf16>
    %c0_63 = arith.constant 0 : index
    %c0_64 = arith.constant 0 : index
    %53 = vector.load %arg14[%c0_63, %c0_64] : memref<64x512xf32, #tpu.memory_space<vmem>>, vector<64x416xf32>
    %54 = arith.truncf %53 : vector<64x416xf32> to vector<64x416xbf16>
    %cst_65 = arith.constant dense<0.000000e+00> : vector<16x416xf32>
    %55 = tpu.matmul %52, %54, %cst_65 {dimension_numbers = #tpu.dot_dimension_numbers<[1], [0], [0], [1], [0, 0, 1, 1], [], []>} : vector<16x64xbf16>, vector<64x416xbf16>, vector<16x416xf32> -> vector<16x416xf32>
    %c0_66 = arith.constant 0 : index
    %c0_67 = arith.constant 0 : index
    %56 = vector.load %arg7[%c0_66, %c0_67] : memref<16x1xf32, #tpu.memory_space<vmem>>, vector<16x1xf32>
    %57 = vector.broadcast %56 : vector<16x1xf32> to vector<16x416xf32>
    %58 = arith.addf %55, %57 : vector<16x416xf32>
    %cst_68 = arith.constant 1.000000e-01 : f32
    %59 = vector.broadcast %cst_68 : f32 to vector<16x416xf32>
    %60 = arith.mulf %59, %58 : vector<16x416xf32>
    %61 = arith.maximumf %58, %60 : vector<16x416xf32>
    %c0_69 = arith.constant 0 : index
    %c0_70 = arith.constant 0 : index
    %62 = vector.load %arg13[%c0_69, %c0_70] : memref<16x512xf32, #tpu.memory_space<vmem>>, vector<16x416xf32>
    tpu.vector_store %arg13[%c0_69, %c0_70], %61 {strides = array<i32>} : memref<16x512xf32, #tpu.memory_space<vmem>>, vector<16x416xf32>,
    %c0_71 = arith.constant 0 : index
    %c0_72 = arith.constant 0 : index
    %63 = vector.load %arg13[%c0_71, %c0_72] : memref<16x512xf32, #tpu.memory_space<vmem>>, vector<16x288xf32>
    %c0_73 = arith.constant 0 : index
    %c0_74 = arith.constant 0 : index
    %64 = vector.load %arg14[%c0_73, %c0_74] : memref<64x512xf32, #tpu.memory_space<vmem>>, vector<16x288xf32>
    tpu.vector_store %arg14[%c0_73, %c0_74], %63 {strides = array<i32>} : memref<64x512xf32, #tpu.memory_space<vmem>>, vector<16x288xf32>,
    %c0_75 = arith.constant 0 : index
    %c8_76 = arith.constant 8 : index
    %65 = vector.load %arg13[%c0_75, %c8_76] : memref<16x512xf32, #tpu.memory_space<vmem>>, vector<16x288xf32>
    %c16_77 = arith.constant 16 : index
    %c0_78 = arith.constant 0 : index
    %66 = vector.load %arg14[%c16_77, %c0_78] : memref<64x512xf32, #tpu.memory_space<vmem>>, vector<16x288xf32>
    tpu.vector_store %arg14[%c16_77, %c0_78], %65 {strides = array<i32>} : memref<64x512xf32, #tpu.memory_space<vmem>>, vector<16x288xf32>,
    %c0_79 = arith.constant 0 : index
    %c128 = arith.constant 128 : index
    %67 = vector.load %arg13[%c0_79, %c128] : memref<16x512xf32, #tpu.memory_space<vmem>>, vector<16x288xf32>
    %c32_80 = arith.constant 32 : index
    %c0_81 = arith.constant 0 : index
    %68 = vector.load %arg14[%c32_80, %c0_81] : memref<64x512xf32, #tpu.memory_space<vmem>>, vector<16x288xf32>
    tpu.vector_store %arg14[%c32_80, %c0_81], %67 {strides = array<i32>} : memref<64x512xf32, #tpu.memory_space<vmem>>, vector<16x288xf32>,
    %c0_82 = arith.constant 0 : index
    %c136 = arith.constant 136 : index
    %69 = vector.load %arg13[%c0_82, %c136] : memref<16x512xf32, #tpu.memory_space<vmem>>, vector<16x288xf32>
    %c48_83 = arith.constant 48 : index
    %c0_84 = arith.constant 0 : index
    %70 = vector.load %arg14[%c48_83, %c0_84] : memref<64x512xf32, #tpu.memory_space<vmem>>, vector<16x288xf32>
    tpu.vector_store %arg14[%c48_83, %c0_84], %69 {strides = array<i32>} : memref<64x512xf32, #tpu.memory_space<vmem>>, vector<16x288xf32>,
    %c0_85 = arith.constant 0 : index
    %c0_86 = arith.constant 0 : index
    %71 = vector.load %arg8[%c0_85, %c0_86] : memref<32x64xbf16, #tpu.memory_space<vmem>>, vector<32x64xbf16>
    %c0_87 = arith.constant 0 : index
    %c0_88 = arith.constant 0 : index
    %72 = vector.load %arg14[%c0_87, %c0_88] : memref<64x512xf32, #tpu.memory_space<vmem>>, vector<64x288xf32>
    %73 = arith.truncf %72 : vector<64x288xf32> to vector<64x288xbf16>
    %cst_89 = arith.constant dense<0.000000e+00> : vector<32x288xf32>
    %74 = tpu.matmul %71, %73, %cst_89 {dimension_numbers = #tpu.dot_dimension_numbers<[1], [0], [0], [1], [0, 0, 1, 1], [], []>} : vector<32x64xbf16>, vector<64x288xbf16>, vector<32x288xf32> -> vector<32x288xf32>
    %c0_90 = arith.constant 0 : index
    %c0_91 = arith.constant 0 : index
    %75 = vector.load %arg9[%c0_90, %c0_91] : memref<32x1xf32, #tpu.memory_space<vmem>>, vector<32x1xf32>
    %76 = vector.broadcast %75 : vector<32x1xf32> to vector<32x288xf32>
    %77 = arith.addf %74, %76 : vector<32x288xf32>
    %cst_92 = arith.constant 1.000000e-01 : f32
    %78 = vector.broadcast %cst_92 : f32 to vector<32x288xf32>
    %79 = arith.mulf %78, %77 : vector<32x288xf32>
    %80 = arith.maximumf %77, %79 : vector<32x288xf32>
    %c0_93 = arith.constant 0 : index
    %c0_94 = arith.constant 0 : index
    %81 = vector.load %arg10[%c0_93, %c0_94] : memref<32x288xf32, #tpu.memory_space<vmem>>, vector<32x288xf32>
    tpu.vector_store %arg10[%c0_93, %c0_94], %80 {strides = array<i32>} : memref<32x288xf32, #tpu.memory_space<vmem>>, vector<32x288xf32>,
    return
  }
  func.func @transform_0(%arg0: i32) -> (i32, i32) {
    %c0_i32 = arith.constant 0 : i32
    %c0_i32_0 = arith.constant 0 : i32
    %c0_i32_1 = arith.constant 0 : i32
    return %c0_i32, %c0_i32_0 : i32, i32
  }
  func.func @transform_1(%arg0: i32) -> (i32, i32) {
    %c0_i32 = arith.constant 0 : i32
    %c0_i32_0 = arith.constant 0 : i32
    %c0_i32_1 = arith.constant 0 : i32
    return %c0_i32, %c0_i32_0 : i32, i32
  }
  func.func @transform_2(%arg0: i32) -> (i32, i32) {
    %c0_i32 = arith.constant 0 : i32
    %c0_i32_0 = arith.constant 0 : i32
    %c0_i32_1 = arith.constant 0 : i32
    return %c0_i32, %c0_i32_0 : i32, i32
  }
  func.func @transform_3(%arg0: i32) -> (i32, i32) {
    %c0_i32 = arith.constant 0 : i32
    %c0_i32_0 = arith.constant 0 : i32
    %c0_i32_1 = arith.constant 0 : i32
    return %c0_i32, %c0_i32_0 : i32, i32
  }
  func.func @transform_4(%arg0: i32) -> (i32, i32) {
    %c0_i32 = arith.constant 0 : i32
    %c0_i32_0 = arith.constant 0 : i32
    %c0_i32_1 = arith.constant 0 : i32
    return %c0_i32, %c0_i32_0 : i32, i32
  }
  func.func @transform_5(%arg0: i32) -> (i32, i32) {
    %c0_i32 = arith.constant 0 : i32
    %c0_i32_0 = arith.constant 0 : i32
    %c0_i32_1 = arith.constant 0 : i32
    return %c0_i32, %c0_i32_0 : i32, i32
  }
  func.func @transform_6(%arg0: i32) -> (i32, i32) {
    %c0_i32 = arith.constant 0 : i32
    %c0_i32_0 = arith.constant 0 : i32
    %c0_i32_1 = arith.constant 0 : i32
    return %c0_i32, %c0_i32_0 : i32, i32
  }
  func.func @transform_7(%arg0: i32) -> (i32, i32) {
    %c0_i32 = arith.constant 0 : i32
    %c0_i32_0 = arith.constant 0 : i32
    %c0_i32_1 = arith.constant 0 : i32
    return %c0_i32, %c0_i32_0 : i32, i32
  }
  func.func @transform_8(%arg0: i32) -> (i32, i32) {
    %c0_i32 = arith.constant 0 : i32
    %c0_i32_0 = arith.constant 0 : i32
    %c0_i32_1 = arith.constant 0 : i32
    return %c0_i32, %c0_i32_0 : i32, i32
  }
  func.func @transform_9(%arg0: i32) -> (i32, i32) {
    %c0_i32 = arith.constant 0 : i32
    %c0_i32_0 = arith.constant 0 : i32
    %c0_i32_1 = arith.constant 0 : i32
    return %c0_i32, %c0_i32_0 : i32, i32
  }
}

</mosaic_0001>

<bundles_post_ra>
// kernel: temporal_convnet2d_forward.1
= control target key start
LH: loop header
LB: loop body
LE: loop exit
PB: predicated region body
PF: predicated region fallthrough
CT: control target
= control target key end

     0   :  { %s1122_s11 = smov 111   ;;  %s1123_s12 = smov 112   ;;  %vm48_vm0 = vcmask 916480   ;;  %v1125_v11 = vmov 0   ;;  %vm125_vm1 = vcmask 908288   ;;  %vm66_vm2 = vcmask 1039360   ;;  %s1535_s0 = inlined_call_operand.vmem [shape: f32[8,640], index: 0, kind: input, shape index: {}]   ;;  %s1536_s2 = inlined_call_operand.vmem [shape: f32[8,1], index: 2, kind: input, shape index: {}]   ;;  %s1537_s1 = inlined_call_operand.vmem [shape: bf16[8,32], index: 1, kind: input, shape index: {}]   ;;  %s1538_s4 = inlined_call_operand.vmem [shape: f32[16,1], index: 4, kind: input, shape index: {}]   ;;  %s1539_s3 = inlined_call_operand.vmem [shape: bf16[16,32], index: 3, kind: input, shape index: {}]   ;;  %s1540_s6 = inlined_call_operand.vmem [shape: f32[16,1], index: 6, kind: input, shape index: {}]   ;;  %s1541_s5 = inlined_call_operand.vmem [shape: bf16[16,64], index: 5, kind: input, shape index: {}]   ;;  %s1542_s8 = inlined_call_operand.vmem [shape: f32[32,1], index: 8, kind: input, shape index: {}]   ;;  %s1543_s7 = inlined_call_operand.vmem [shape: bf16[32,64], index: 7, kind: input, shape index: {}]   ;;  %s1544_s9 = inlined_call_operand.vmem [shape: f32[32,288], index: 9, kind: output, shape index: {}]  }
   0x1   :  { %v105_v0 = vld [vmem:[%s1535_s0] sm:$0xff]  ;;  %s1124_s13 = smov 127   ;;  %v1190_v1 = vld [vmem:[%s1535_s0 + $0x8] sm:$0xff]  ;;  %v108_v3 = vld [vmem:[%s1535_s0 + $0x18] sm:$0xff]  ;;  %1119 = vset.pattern.permute.xlu1 %v1125_v11  ;;  %1121 = vset.pattern.permute.xlu0 %v1125_v11  ;;  %vm169_vm3 = vcmask 261120   ;;  %vm33_vm4 = vcmask 1048448  }
   0x2   :  { %115 = vrot.lane.b32.xlu1 %v105_v0, %s1122_s11  ;;  %86 = vrot.lane.b32.xlu0 %v105_v0, %s1123_s12  ;;  %v109_v2 = vld [vmem:[%s1535_s0 + $0x20] sm:$0xff]  ;;  %v1204_v4 = vld [vmem:[%s1535_s0 + $0x10] sm:$0xff]  ;;  %49 = vst.msk [vmem:[#allocation5 + $0x18] sm:$0xff] %vm48_vm0, %v108_v3  ;;  %v1126_v43 = vmov 0.0   ;;  %vm244_vm5 = vcmask 654336   ;;  %s1128_s24 = smov 94  }
   0x3   :  { %58 = vrot.lane.b32.xlu2 %v105_v0, %s1124_s13  ;;  %v163_v12 = vld [vmem:[%s1536_s2] sm:$0xff]  ;;  %34 = vst.msk [vmem:[#allocation2 + $0x18] sm:$0xff] %vm33_vm4, %v1126_v43  ;;  %s1129_s25 = smov 126   ;;  %vm318_vm6 = vcmask 769024   ;;  %vm290_vm7 = vcmask 785408   ;;  %vm262_vm8 = vcmask 1031168  }
   0x4   :  { %1120 = vset.pattern.permute.xlu2 %v1125_v11  ;;  %v138_v22 = vld [vmem:[%s1537_s1] sm:$0xf]  ;;  %s1127_s1 = smov 96   ;;  %vm35_vm9 = vcmask 1048192   ;;  %vm504_vm10 = vcmask 1022976   ;;  %vm613_vm11 = vcmask 629760  }
   0x5   :  { %36 = vst.msk [vmem:[#allocation3 + $0x18] sm:$0xff] %vm35_vm9, %v1126_v43  ;;  %vm38_vm12 = vcmask 1047808   ;;  %vm703_vm13 = vcmask 523264   ;;  %vm823_vm14 = vcmask 982016  }
   0x6   :  { %37 = vst.msk [vmem:[#allocation3 + $0x38] sm:$0xff] %vm35_vm9, %v1126_v43 }
   0x7   :  { %39 = vst.msk [vmem:[#allocation4 + $0x18] sm:$0xff] %vm38_vm12, %v1126_v43 }
   0x8   :  { %40 = vst.msk [vmem:[#allocation4 + $0x38] sm:$0xff] %vm38_vm12, %v1126_v43 }
   0x9   :  { %v142_v26 = vld [vmem:[#allocation5 + $0x18] sm:$0xff] }
   0xa   :  { %117 = vrot.lane.b32.xlu1 %v1190_v1, %s1122_s11  ;;  %88 = vrot.lane.b32.xlu0 %v1190_v1, %s1123_s12 }
   0xb   :  { %60 = vrot.lane.b32.xlu2 %v1190_v1, %s1124_s13 }
  0x12   :  { %123 = vrot.lane.b32.xlu1 %v109_v2, %s1122_s11  ;;  %121 = vrot.lane.b32.xlu0 %v108_v3, %s1122_s11 }
  0x13   :  { %92 = vrot.lane.b32.xlu2 %v108_v3, %s1123_s12 }
  0x1a   :  { %119 = vrot.lane.b32.xlu1 %v1204_v4, %s1122_s11  ;;  %90 = vrot.lane.b32.xlu0 %v1204_v4, %s1123_s12  ;;  %s1132_s11 = smov 125  }
  0x1b   :  { %64 = vrot.lane.b32.xlu2 %v108_v3, %s1124_s13 }
  0x22   :  { %62 = vrot.lane.b32.xlu0 %v1204_v4, %s1124_s13  ;;  %166 = vperm.xlu1 %1119, %v163_v12  }
  0x5d   :  { %v59_v5 = vpop.permute.xlu2 %58 }
  0x65   :  { %v61_v6 = vpop.permute.xlu2 %60 }
  0x66   :  { %v67_v18 = vsel %vm66_vm2, %v59_v5, %v61_v6 }
  0x67   :  { %v155_v19 = vpack.c.bf16 %v67_v18, %v105_v0  ;;  %v1103_v18 = vld [vmem:[%s1539_s3] sm:$0xff]  ;;  %s1130_s3 = smov 77  }
  0x6d   :  { %v93_v7 = vpop.permute.xlu2 %92 }
  0x6e   :  { %104 = vst.msk [vmem:[#allocation5 + $0x58] sm:$0xff] %vm48_vm0, %v93_v7 }
  0x74   :  { %v116_v8 = vpop.permute.xlu1 %115  ;;  %v87_v9 = vpop.permute.xlu0 %86 }
  0x75   :  { %v65_v10 = vpop.permute.xlu2 %64  ;;  %v150_v31 = vld [vmem:[#allocation5 + $0x58] sm:$0xff] }
  0x76   :  { %77 = vst.msk [vmem:[#allocation5 + $0x38] sm:$0xff] %vm48_vm0, %v65_v10 }
  0x7c   :  { %v118_v13 = vpop.permute.xlu1 %117  ;;  %v89_v14 = vpop.permute.xlu0 %88 }
  0x7d   :  { %v126_v15 = vsel %vm125_vm1, %v116_v8, %v118_v13  ;;  %v94_v16 = vsel %vm48_vm0, %v87_v9, %v89_v14  ;;  %v146_v33 = vld [vmem:[#allocation5 + $0x38] sm:$0xff]  ;;  %v357_v9 = vld [vmem:[%s1538_s4 + $0x8] sm:$0xff] }
  0x7e   :  { %v159_v17 = vpack.c.bf16 %v126_v15, %v94_v16  ;;  %v158_v37 = vpack.c.bf16 %v146_v33, %v142_v26 }
  0x80   :  { %179 = vmatpush.bf16.msra.mxu3 %v159_v17 }
  0x84   :  { %v124_v20 = vpop.permute.xlu1 %123  ;;  %v122_v21 = vpop.permute.xlu0 %121  ;;  %180 = vmatpush.bf16.msra.mxu3 %v155_v19 }
  0x85   :  { %v129_v23 = vsel %vm125_vm1, %v122_v21, %v124_v20 }
  0x86   :  { %137 = vst.msk [vmem:[#allocation5 + $0x78] sm:$0xff] %vm48_vm0, %v129_v23 }
  0x87   :  { %1069 = vmatmul.msk.bf16.vlgmr.msra.gmra.mxu3 %vm169_vm3, %v138_v22 }
  0x8c   :  { %v120_v24 = vpop.permute.xlu1 %119  ;;  %v91_v25 = vpop.permute.xlu0 %90 }
  0x8d   :  { %v127_v27 = vsel %vm125_vm1, %v118_v13, %v120_v24  ;;  %v128_v28 = vsel %vm125_vm1, %v120_v24, %v122_v21  ;;  %v95_v29 = vsel %vm48_vm0, %v89_v14, %v91_v25  ;;  %v96_v30 = vsel %vm48_vm0, %v91_v25, %v93_v7  ;;  %v154_v32 = vld [vmem:[#allocation5 + $0x78] sm:$0xff] }
  0x8e   :  { %v162_v34 = vpack.c.bf16 %v154_v32, %v150_v31  ;;  %v160_v35 = vpack.c.bf16 %v127_v27, %v95_v29  ;;  %v161_v36 = vpack.c.bf16 %v128_v28, %v96_v30 }
  0x90   :  { %218 = vmatpush.bf16.msrb.mxu3 %v162_v34  ;;  %192 = vmatpush.bf16.msra.mxu1 %v160_v35 }
  0x91   :  { %205 = vmatpush.bf16.msra.mxu2 %v161_v36 }
  0x94   :  { %v63_v38 = vpop.permute.xlu0 %62  ;;  %219 = vmatpush.bf16.msrb.mxu3 %v158_v37  ;;  %v167_v44 = vpop.permute.xlu1 %166 }
  0x95   :  { %v68_v39 = vsel %vm66_vm2, %v61_v6, %v63_v38  ;;  %v69_v40 = vsel %vm66_vm2, %v63_v38, %v65_v10  ;;  %v356_v10 = vld [vmem:[%s1538_s4] sm:$0xff]  ;;  %s1131_s4 = smov 80  }
  0x96   :  { %v156_v41 = vpack.c.bf16 %v68_v39, %v1190_v1  ;;  %v157_v42 = vpack.c.bf16 %v69_v40, %v1204_v4 }
  0x97   :  { %1072 = vmatmul.msk.bf16.vlgmr.msrb.gmra.mxu3 %vm169_vm3, %v138_v22 }
  0x98   :  { %193 = vmatpush.bf16.msra.mxu1 %v156_v41  ;;  %206 = vmatpush.bf16.msra.mxu2 %v157_v42 }
  0x9b   :  { %1070 = vmatmul.msk.bf16.vlgmr.msra.gmra.mxu1 %vm169_vm3, %v138_v22  ;;  %1071 = vmatmul.msk.bf16.vlgmr.msra.gmra.mxu2 %vm169_vm3, %v138_v22 }
 0x10a   :  { %v182_v45 = vpop.f32.mrf.mxu3 }
 0x10b   :  { %v183_v46 = vadd.f32 %v182_v45, %v167_v44 }
 0x10d   :  { %v225_v47 = vmul.f32 0.1, %v183_v46 }
 0x10f   :  { %v1236_v48 = vmax.f32 %v183_v46, %v225_v47 }
 0x112   :  { %v184_v49 = vpop.f32.mrf.mxu3 }
 0x118   :  { %v195_v50 = vpop.f32.mrf.mxu1 }
 0x119   :  { %v196_v51 = vadd.f32 %v195_v50, %v167_v44 }
 0x11a   :  { %v221_v52 = vpop.f32.mrf.mxu3 }
 0x11b   :  { %v226_v53 = vmul.f32 0.1, %v196_v51  ;;  %v222_v54 = vadd.f32 %v221_v52, %v167_v44 }
 0x11d   :  { %v1238_v55 = vmax.f32 %v196_v51, %v226_v53  ;;  %v228_v56 = vmul.f32 0.1, %v222_v54 }
 0x11e   :  { %v208_v57 = vpop.f32.mrf.mxu2 }
 0x11f   :  { %v232_v58 = vmax.f32 %v222_v54, %v228_v56  ;;  %v209_v59 = vadd.f32 %v208_v57, %v167_v44 }
 0x120   :  { %v197_v60 = vpop.f32.mrf.mxu1 }
 0x121   :  { %236 = vst.msk [vmem:[#allocation2 + $0x18] sm:$0xff] %vm48_vm0, %v232_v58  ;;  %v227_v61 = vmul.f32 0.1, %v209_v59 }
 0x122   :  { %v223_v62 = vpop.f32.mrf.mxu3 }
 0x123   :  { %v231_v63 = vmax.f32 %v209_v59, %v227_v61 }
 0x125   :  { %286 = vrot.lane.b32.xlu1 %v231_v63, %s1127_s1 }
 0x126   :  { %v210_v0 = vpop.f32.mrf.mxu2 }
 0x128   :  { %v240_v1 = vld [vmem:[#allocation2 + $0x18] sm:$0xff] }
 0x129   :  { %316 = vrot.lane.b32.xlu0 %v240_v1, %s1128_s24  ;;  %288 = vrot.lane.b32.xlu2 %v240_v1, %s1127_s1  ;;  %245 = vst.msk [vmem:[#allocation5 + $0x18] sm:$0xff] %vm244_vm5, %v240_v1 }
 0x12d   :  { %258 = vrot.lane.b32.xlu1 %v231_v63, %s1129_s25 }
 0x130   :  { %v335_v22 = vld [vmem:[#allocation5 + $0x18] sm:$0xff] }
 0x131   :  { %314 = vrot.lane.b32.xlu2 %v231_v63, %s1128_s24  ;;  %260 = vrot.lane.b32.xlu0 %v240_v1, %s1129_s25 }
 0x135   :  { %256 = vrot.lane.b32.xlu1 %v1238_v55, %s1129_s25 }
 0x139   :  { %284 = vrot.lane.b32.xlu2 %v1238_v55, %s1127_s1  ;;  %312 = vrot.lane.b32.xlu0 %v1238_v55, %s1128_s24 }
 0x13d   :  { %254 = vrot.lane.b32.xlu1 %v1236_v48, %s1129_s25 }
 0x141   :  { %310 = vrot.lane.b32.xlu0 %v1236_v48, %s1128_s24  ;;  %282 = vrot.lane.b32.xlu2 %v1236_v48, %s1127_s1 }
 0x149   :  { %365 = vperm.xlu0 %1121, %v357_v9   ;;  %360 = vperm.xlu2 %1120, %v356_v10  }
 0x183   :  { %v289_v2 = vpop.permute.xlu2 %288 }
 0x184   :  { %301 = vst.msk [vmem:[#allocation5 + $0x58] sm:$0xff] %vm244_vm5, %v289_v2 }
 0x18b   :  { %v315_v4 = vpop.permute.xlu2 %314  ;;  %v343_v13 = vld [vmem:[#allocation5 + $0x58] sm:$0xff] }
 0x193   :  { %v285_v19 = vpop.permute.xlu2 %284 }
 0x197   :  { %v287_v3 = vpop.permute.xlu1 %286 }
 0x198   :  { %v293_v7 = vsel %vm290_vm7, %v287_v3, %v289_v2  ;;  %v292_v24 = vsel %vm290_vm7, %v285_v19, %v287_v3 }
 0x19b   :  { %v317_v5 = vpop.permute.xlu0 %316  ;;  %v283_v29 = vpop.permute.xlu2 %282 }
 0x19c   :  { %v321_v6 = vsel %vm318_vm6, %v315_v4, %v317_v5  ;;  %329 = vst.msk [vmem:[#allocation5 + $0x78] sm:$0xff] %vm244_vm5, %v317_v5  ;;  %v291_v33 = vsel %vm290_vm7, %v283_v29, %v285_v19 }
 0x19d   :  { %v354_v8 = vpack.c.bf16 %v321_v6, %v293_v7 }
 0x19f   :  { %v259_v11 = vpop.permute.xlu1 %258  ;;  %410 = vmatpush.bf16.msrb.mxu2 %v354_v8 }
 0x1a3   :  { %v261_v12 = vpop.permute.xlu0 %260  ;;  %v347_v14 = vld [vmem:[#allocation5 + $0x78] sm:$0xff]  ;;  %v361_v38 = vpop.permute.xlu2 %360 }
 0x1a4   :  { %273 = vst.msk [vmem:[#allocation5 + $0x38] sm:$0xff] %vm244_vm5, %v261_v12  ;;  %v355_v15 = vpack.c.bf16 %v347_v14, %v343_v13  ;;  %v265_v16 = vsel %vm262_vm8, %v259_v11, %v261_v12  ;;  %v687_v14 = vld [vmem:[%s1540_s6 + $0x8] sm:$0xff] }
 0x1a5   :  { %v350_v17 = vpack.c.bf16 %v265_v16, %v231_v63 }
 0x1a6   :  { %424 = vmatpush.bf16.msra.mxu3 %v355_v15  ;;  %v686_v15 = vld [vmem:[%s1540_s6] sm:$0xff] }
 0x1a7   :  { %411 = vmatpush.bf16.msrb.mxu2 %v350_v17  ;;  %v257_v20 = vpop.permute.xlu1 %256 }
 0x1a8   :  { %v264_v28 = vsel %vm262_vm8, %v257_v20, %v259_v11 }
 0x1a9   :  { %v349_v30 = vpack.c.bf16 %v264_v28, %v1238_v55 }
 0x1aa   :  { %1079 = vmatmul.msk.bf16.vlgmr.msrb.gmra.mxu2 %vm169_vm3, %v1103_v18 }
 0x1ab   :  { %v313_v21 = vpop.permute.xlu0 %312  ;;  %v339_v23 = vld [vmem:[#allocation5 + $0x38] sm:$0xff] }
 0x1ac   :  { %v320_v25 = vsel %vm318_vm6, %v313_v21, %v315_v4  ;;  %v351_v26 = vpack.c.bf16 %v339_v23, %v335_v22 }
 0x1ad   :  { %v353_v27 = vpack.c.bf16 %v320_v25, %v292_v24 }
 0x1ae   :  { %425 = vmatpush.bf16.msra.mxu3 %v351_v26 }
 0x1af   :  { %396 = vmatpush.bf16.msrb.mxu1 %v353_v27  ;;  %v255_v32 = vpop.permute.xlu1 %254 }
 0x1b0   :  { %v263_v36 = vsel %vm262_vm8, %v255_v32, %v257_v20 }
 0x1b1   :  { %1080 = vmatmul.msk.bf16.vlgmr.msra.gmra.mxu3 %vm169_vm3, %v1103_v18  ;;  %v348_v37 = vpack.c.bf16 %v263_v36, %v1236_v48 }
 0x1b3   :  { %v311_v31 = vpop.permute.xlu0 %310  ;;  %397 = vmatpush.bf16.msrb.mxu1 %v349_v30 }
 0x1b4   :  { %v319_v34 = vsel %vm318_vm6, %v311_v31, %v313_v21 }
 0x1b5   :  { %v352_v35 = vpack.c.bf16 %v319_v34, %v291_v33 }
 0x1b6   :  { %1078 = vmatmul.msk.bf16.vlgmr.msrb.gmra.mxu1 %vm169_vm3, %v1103_v18 }
 0x1b7   :  { %382 = vmatpush.bf16.msra.mxu0 %v352_v35 }
 0x1bb   :  { %383 = vmatpush.bf16.msra.mxu0 %v348_v37  ;;  %v366_v45 = vpop.permute.xlu0 %365 }
 0x1be   :  { %1077 = vmatmul.msk.bf16.vlgmr.msra.gmra.mxu0 %vm169_vm3, %v1103_v18 }
 0x22d   :  { %v413_v39 = vpop.f32.mrf.mxu2 }
 0x22e   :  { %v414_v40 = vadd.f32 %v413_v39, %v361_v38 }
 0x230   :  { %v434_v41 = vmul.f32 0.1, %v414_v40 }
 0x232   :  { %v1277_v42 = vmax.f32 %v414_v40, %v434_v41 }
 0x233   :  { %v399_v44 = vpop.f32.mrf.mxu1 }
 0x234   :  { %v427_v46 = vpop.f32.mrf.mxu3  ;;  %v400_v47 = vadd.f32 %v399_v44, %v361_v38  ;;  %466 = vst [vmem:[#allocation5 + $0x10] sm:$0xff] %v1277_v42 }
 0x235   :  { %v428_v49 = vadd.f32 %v427_v46, %v361_v38  ;;  %v415_v48 = vpop.f32.mrf.mxu2 }
 0x236   :  { %v433_v50 = vmul.f32 0.1, %v400_v47  ;;  %v416_v51 = vadd.f32 %v415_v48, %v366_v45 }
 0x237   :  { %v435_v52 = vmul.f32 0.1, %v428_v49 }
 0x238   :  { %v1280_v53 = vmax.f32 %v400_v47, %v433_v50  ;;  %v438_v54 = vmul.f32 0.1, %v416_v51 }
 0x239   :  { %v443_v55 = vmax.f32 %v428_v49, %v435_v52 }
 0x23a   :  { %v1282_v56 = vmax.f32 %v416_v51, %v438_v54  ;;  %599 = vrot.lane.b32.xlu0 %v1280_v53, %s1130_s3  ;;  %545 = vrot.lane.b32.xlu1 %v1280_v53, %s1131_s4 }
 0x23b   :  { %451 = vst.msk [vmem:[#allocation3 + $0x18] sm:$0xff] %vm244_vm5, %v443_v55  ;;  %v385_v57 = vpop.f32.mrf.mxu0  ;;  %v401_v58 = vpop.f32.mrf.mxu1 }
 0x23c   :  { %v429_v59 = vpop.f32.mrf.mxu3  ;;  %v386_v60 = vadd.f32 %v385_v57, %v361_v38  ;;  %v402_v61 = vadd.f32 %v401_v58, %v366_v45  ;;  %v672_v62 = vpack.c.bf16 %v1282_v56, %v1277_v42  ;;  %470 = vst [vmem:[#allocation5 + $0x30] sm:$0xff] %v1282_v56 }
 0x23d   :  { %v430_v63 = vadd.f32 %v429_v59, %v366_v45 }
 0x23e   :  { %v432_v0 = vmul.f32 0.1, %v386_v60  ;;  %v437_v1 = vmul.f32 0.1, %v402_v61 }
 0x23f   :  { %v439_v2 = vmul.f32 0.1, %v430_v63 }
 0x240   :  { %v1292_v3 = vmax.f32 %v386_v60, %v432_v0  ;;  %v1294_v4 = vmax.f32 %v402_v61, %v437_v1 }
 0x241   :  { %v447_v5 = vmax.f32 %v430_v63, %v439_v2  ;;  %v1104_v2 = vld [vmem:[%s1541_s5] sm:$0xff]  ;;  %s1133_s5 = smov 120  }
 0x242   :  { %553 = vrot.lane.b32.xlu2 %v1294_v4, %s1131_s4  ;;  %490 = vrot.lane.b32.xlu0 %v1280_v53, %s1132_s11  ;;  %v475_v6 = vld [vmem:[#allocation3 + $0x18] sm:$0xff]  ;;  %v671_v7 = vpack.c.bf16 %v1294_v4, %v1280_v53 }
 0x243   :  { %455 = vst.msk [vmem:[#allocation3 + $0x38] sm:$0xff] %vm244_vm5, %v447_v5  ;;  %v387_v8 = vpop.f32.mrf.mxu0  ;;  %607 = vrot.lane.b32.xlu1 %v1294_v4, %s1130_s3 }
 0x244   :  { %v388_v9 = vadd.f32 %v387_v8, %v366_v45  ;;  %467 = vst.msk [vmem:[#allocation5 + $0x18] sm:$0xff] %vm169_vm3, %v475_v6 }
 0x246   :  { %v436_v10 = vmul.f32 0.1, %v388_v9 }
 0x248   :  { %v1306_v11 = vmax.f32 %v388_v9, %v436_v10 }
 0x24a   :  { %494 = vrot.lane.b32.xlu2 %v475_v6, %s1132_s11  ;;  %601 = vrot.lane.b32.xlu0 %v1277_v42, %s1130_s3  ;;  %v479_v12 = vld [vmem:[#allocation3 + $0x38] sm:$0xff]  ;;  %v670_v13 = vpack.c.bf16 %v1306_v11, %v1292_v3 }
 0x24b   :  { %603 = vrot.lane.b32.xlu1 %v475_v6, %s1130_s3  ;;  %471 = vst.msk [vmem:[#allocation5 + $0x38] sm:$0xff] %vm169_vm3, %v479_v12  ;;  %v641_v59 = vld [vmem:[#allocation5 + $0x18] sm:$0xff] }
 0x252   :  { %492 = vrot.lane.b32.xlu2 %v1277_v42, %s1132_s11  ;;  %502 = vrot.lane.b32.xlu0 %v479_v12, %s1132_s11  ;;  %v645_v50 = vld [vmem:[#allocation5 + $0x38] sm:$0xff] }
 0x253   :  { %549 = vrot.lane.b32.xlu1 %v475_v6, %s1131_s4  ;;  %v673_v61 = vpack.c.bf16 %v645_v50, %v641_v59  ;;  %v932_v59 = vld [vmem:[%s1542_s8] sm:$0xff] }
 0x25a   :  { %611 = vrot.lane.b32.xlu2 %v479_v12, %s1130_s3  ;;  %500 = vrot.lane.b32.xlu0 %v1282_v56, %s1132_s11 }
 0x25b   :  { %547 = vrot.lane.b32.xlu1 %v1277_v42, %s1131_s4 }
 0x262   :  { %557 = vrot.lane.b32.xlu2 %v479_v12, %s1131_s4  ;;  %605 = vrot.lane.b32.xlu0 %v1306_v11, %s1130_s3 }
 0x263   :  { %609 = vrot.lane.b32.xlu1 %v1282_v56, %s1130_s3 }
 0x26a   :  { %555 = vrot.lane.b32.xlu2 %v1282_v56, %s1131_s4  ;;  %488 = vrot.lane.b32.xlu0 %v1292_v3, %s1132_s11 }
 0x26b   :  { %498 = vrot.lane.b32.xlu1 %v1294_v4, %s1132_s11 }
 0x272   :  { %597 = vrot.lane.b32.xlu2 %v1292_v3, %s1130_s3  ;;  %695 = vperm.xlu0 %1121, %v687_v14  }
 0x273   :  { %543 = vrot.lane.b32.xlu1 %v1292_v3, %s1131_s4 }
 0x27a   :  { %551 = vrot.lane.b32.xlu2 %v1306_v11, %s1131_s4 }
 0x27b   :  { %496 = vrot.lane.b32.xlu1 %v1306_v11, %s1132_s11 }
 0x282   :  { %690 = vperm.xlu2 %1120, %v686_v15  }
 0x29c   :  { %v1349_v16 = vpop.permute.xlu2 %553 }
 0x2a4   :  { %v495_v17 = vpop.permute.xlu2 %494 }
 0x2a5   :  { %522 = vst.msk [vmem:[#allocation5 + $0x58] sm:$0xff] %vm169_vm3, %v495_v17 }
 0x2ac   :  { %v600_v18 = vpop.permute.xlu0 %599  ;;  %v1352_v19 = vpop.permute.xlu2 %492  ;;  %v649_v47 = vld [vmem:[#allocation5 + $0x58] sm:$0xff] }
 0x2ad   :  { %v1356_v20 = vsel %vm504_vm10, %v1352_v19, %v495_v17  ;;  %v1358_v21 = vpop.permute.xlu1 %545 }
 0x2ae   :  { %521 = vst [vmem:[#allocation5 + $0x50] sm:$0xff] %v1356_v20 }
 0x2b4   :  { %v1361_v22 = vpop.permute.xlu0 %490  ;;  %v612_v23 = vpop.permute.xlu2 %611 }
 0x2b5   :  { %635 = vst.msk [vmem:[#allocation5 + $0xf8] sm:$0xff] %vm169_vm3, %v612_v23  ;;  %v608_v24 = vpop.permute.xlu1 %607  ;;  %v506_v10 = vsel %vm504_vm10, %v1361_v22, %v1352_v19 }
 0x2bc   :  { %v602_v25 = vpop.permute.xlu0 %601  ;;  %v558_v26 = vpop.permute.xlu2 %557  ;;  %v669_v34 = vld [vmem:[#allocation5 + $0xf8] sm:$0xff] }
 0x2bd   :  { %580 = vst.msk [vmem:[#allocation5 + $0xb8] sm:$0xff] %vm169_vm3, %v558_v26  ;;  %v604_v27 = vpop.permute.xlu1 %603  ;;  %v615_v55 = vsel %vm613_vm11, %v600_v18, %v602_v25 }
 0x2be   :  { %v616_v28 = vsel %vm613_vm11, %v602_v25, %v604_v27  ;;  %631 = vst.msk [vmem:[#allocation5 + $0xd8] sm:$0xff] %vm169_vm3, %v604_v27 }
 0x2bf   :  { %630 = vst [vmem:[#allocation5 + $0xd0] sm:$0xff] %v616_v28 }
 0x2c4   :  { %v503_v29 = vpop.permute.xlu0 %502  ;;  %v556_v30 = vpop.permute.xlu2 %555  ;;  %v661_v41 = vld [vmem:[#allocation5 + $0xb8] sm:$0xff] }
 0x2c5   :  { %526 = vst.msk [vmem:[#allocation5 + $0x78] sm:$0xff] %vm169_vm3, %v503_v29  ;;  %v564_v31 = vsel %vm244_vm5, %v556_v30, %v558_v26  ;;  %v550_v32 = vpop.permute.xlu1 %549  ;;  %v665_v33 = vld [vmem:[#allocation5 + $0xd8] sm:$0xff]  ;;  %v563_v5 = vsel %vm244_vm5, %v1349_v16, %v556_v30 }
 0x2c6   :  { %579 = vst [vmem:[#allocation5 + $0xb0] sm:$0xff] %v564_v31  ;;  %v685_v35 = vpack.c.bf16 %v669_v34, %v665_v33 }
 0x2c7   :  { %576 = vst.msk [vmem:[#allocation5 + $0x98] sm:$0xff] %vm169_vm3, %v550_v32 }
 0x2c8   :  { %753 = vmatpush.bf16.msrb.mxu3 %v685_v35 }
 0x2cc   :  { %v501_v36 = vpop.permute.xlu0 %500  ;;  %v653_v45 = vld [vmem:[#allocation5 + $0x78] sm:$0xff]  ;;  %v598_v46 = vpop.permute.xlu2 %597 }
 0x2cd   :  { %v510_v37 = vsel %vm504_vm10, %v501_v36, %v503_v29  ;;  %v548_v38 = vpop.permute.xlu1 %547  ;;  %v677_v49 = vpack.c.bf16 %v653_v45, %v649_v47  ;;  %v614_v51 = vsel %vm613_vm11, %v598_v46, %v600_v18 }
 0x2ce   :  { %525 = vst [vmem:[#allocation5 + $0x70] sm:$0xff] %v510_v37  ;;  %v561_v39 = vsel %vm244_vm5, %v548_v38, %v550_v32  ;;  %v657_v40 = vld [vmem:[#allocation5 + $0x98] sm:$0xff]  ;;  %v560_v1 = vsel %vm244_vm5, %v1358_v21, %v548_v38  ;;  %v676_v15 = vpack.c.bf16 %v510_v37, %v1356_v20 }
 0x2cf   :  { %575 = vst [vmem:[#allocation5 + $0x90] sm:$0xff] %v561_v39  ;;  %v681_v44 = vpack.c.bf16 %v661_v41, %v657_v40  ;;  %v679_v6 = vpack.c.bf16 %v563_v5, %v560_v1  ;;  %v680_v8 = vpack.c.bf16 %v564_v31, %v561_v39 }
 0x2d1   :  { %754 = vmatpush.bf16.msrb.mxu3 %v681_v44 }
 0x2d4   :  { %v606_v48 = vpop.permute.xlu0 %605  ;;  %v552_v17 = vpop.permute.xlu2 %551 }
 0x2d5   :  { %755 = vmatpush.bf16.msrb.mxu3 %v677_v49  ;;  %v610_v52 = vpop.permute.xlu1 %609  ;;  %v617_v54 = vsel %vm613_vm11, %v606_v48, %v608_v24  ;;  %v562_v18 = vsel %vm244_vm5, %v552_v17, %v1349_v16 }
 0x2d6   :  { %v618_v57 = vsel %vm613_vm11, %v608_v24, %v610_v52  ;;  %v619_v58 = vsel %vm613_vm11, %v610_v52, %v612_v23  ;;  %v682_v60 = vpack.c.bf16 %v617_v54, %v614_v51 }
 0x2d7   :  { %634 = vst [vmem:[#allocation5 + $0xf0] sm:$0xff] %v619_v58  ;;  %v683_v63 = vpack.c.bf16 %v618_v57, %v615_v55  ;;  %v684_v0 = vpack.c.bf16 %v619_v58, %v616_v28 }
 0x2d8   :  { %711 = vmatpush.bf16.msrb.mxu0 %v682_v60  ;;  %v933_v60 = vld [vmem:[%s1542_s8 + $0x8] sm:$0xff] }
 0x2d9   :  { %756 = vmatpush.bf16.msrb.mxu3 %v673_v61  ;;  %725 = vmatpush.bf16.msra.mxu1 %v683_v63  ;;  %v935_v61 = vld [vmem:[%s1542_s8 + $0x18] sm:$0xff]  ;;  %v934_v63 = vld [vmem:[%s1542_s8 + $0x10] sm:$0xff] }
 0x2da   :  { %739 = vmatpush.bf16.msra.mxu2 %v684_v0 }
 0x2dc   :  { %1088 = vmatmul.msk.bf16.vlgmr.msrb.gmra.mxu3 %vm703_vm13, %v1104_v2  ;;  %v489_v20 = vpop.permute.xlu0 %488  ;;  %v691_v42 = vpop.permute.xlu2 %690 }
 0x2dd   :  { %v499_v9 = vpop.permute.xlu1 %498  ;;  %726 = vmatpush.bf16.msra.mxu1 %v679_v6  ;;  %v505_v53 = vsel %vm504_vm10, %v489_v20, %v1361_v22 }
 0x2de   :  { %v509_v12 = vsel %vm504_vm10, %v499_v9, %v501_v36  ;;  %740 = vmatpush.bf16.msra.mxu2 %v680_v8 }
 0x2df   :  { %v675_v14 = vpack.c.bf16 %v509_v12, %v506_v10 }
 0x2e1   :  { %727 = vmatpush.bf16.msra.mxu1 %v675_v14 }
 0x2e2   :  { %741 = vmatpush.bf16.msra.mxu2 %v676_v15 }
 0x2e4   :  { %v696_v22 = vpop.permute.xlu0 %695 }
 0x2e5   :  { %v544_v43 = vpop.permute.xlu1 %543  ;;  %728 = vmatpush.bf16.msra.mxu1 %v671_v7 }
 0x2e6   :  { %v559_v19 = vsel %vm244_vm5, %v544_v43, %v1358_v21  ;;  %742 = vmatpush.bf16.msra.mxu2 %v672_v62 }
 0x2e7   :  { %v678_v23 = vpack.c.bf16 %v562_v18, %v559_v19 }
 0x2e8   :  { %1086 = vmatmul.msk.bf16.vlgmr.msra.gmra.mxu1 %vm703_vm13, %v1104_v2 }
 0x2e9   :  { %1087 = vmatmul.msk.bf16.vlgmr.msra.gmra.mxu2 %vm703_vm13, %v1104_v2  ;;  %712 = vmatpush.bf16.msrb.mxu0 %v678_v23 }
 0x2ed   :  { %v497_v24 = vpop.permute.xlu1 %496 }
 0x2ee   :  { %v508_v4 = vsel %vm504_vm10, %v497_v24, %v499_v9 }
 0x2ef   :  { %v674_v7 = vpack.c.bf16 %v508_v4, %v505_v53 }
 0x2f1   :  { %713 = vmatpush.bf16.msrb.mxu0 %v674_v7 }
 0x2f5   :  { %714 = vmatpush.bf16.msrb.mxu0 %v670_v13 }
 0x2f8   :  { %1085 = vmatmul.msk.bf16.vlgmr.msrb.gmra.mxu0 %vm703_vm13, %v1104_v2 }
 0x35f   :  { %v758_v56 = vpop.f32.mrf.mxu3 }
 0x360   :  { %v759_v62 = vadd.f32 %v758_v56, %v691_v42 }
 0x362   :  { %v766_v16 = vmul.f32 0.1, %v759_v62 }
 0x364   :  { %v774_v21 = vmax.f32 %v759_v62, %v766_v16 }
 0x365   :  { %v730_v25 = vpop.f32.mrf.mxu1 }
 0x366   :  { %782 = vst.msk [vmem:[#allocation4 + $0x18] sm:$0xff] %vm169_vm3, %v774_v21  ;;  %v731_v26 = vadd.f32 %v730_v25, %v691_v42  ;;  %v1105_v21 = vld [vmem:[%s1543_s7] sm:$0xff] }
 0x367   :  { %v760_v27 = vpop.f32.mrf.mxu3 }
 0x368   :  { %v761_v28 = vadd.f32 %v760_v27, %v696_v22  ;;  %v764_v29 = vmul.f32 0.1, %v731_v26 }
 0x36a   :  { %v770_v30 = vmul.f32 0.1, %v761_v28  ;;  %v772_v31 = vmax.f32 %v731_v26, %v764_v29 }
 0x36c   :  { %v778_v32 = vmax.f32 %v761_v28, %v770_v30  ;;  %v744_v3 = vpop.f32.mrf.mxu2 }
 0x36d   :  { %v842_v11 = vld [vmem:[#allocation4 + $0x18] sm:$0xff]  ;;  %v745_v13 = vadd.f32 %v744_v3, %v691_v42  ;;  %v732_v33 = vpop.f32.mrf.mxu1 }
 0x36e   :  { %848 = vst.msk [vmem:[#allocation5 + $0x90] sm:$0xff] %vm169_vm3, %v842_v11  ;;  %868 = vrot.lane.b32.xlu1 %v842_v11, %s1133_s5  ;;  %v733_v34 = vadd.f32 %v732_v33, %v696_v22 }
 0x36f   :  { %786 = vst.msk [vmem:[#allocation4 + $0x38] sm:$0xff] %vm169_vm3, %v778_v32  ;;  %v765_v35 = vmul.f32 0.1, %v745_v13 }
 0x370   :  { %v768_v36 = vmul.f32 0.1, %v733_v34 }
 0x371   :  { %v1415_v37 = vmax.f32 %v745_v13, %v765_v35  ;;  %v1106_v13 = vld [vmem:[%s1543_s7 + $0x8] sm:$0xff] }
 0x372   :  { %v776_v38 = vmax.f32 %v733_v34, %v768_v36 }
 0x373   :  { %795 = vst.msk [vmem:[#allocation5 + $0x10] sm:$0xff] %vm169_vm3, %v1415_v37 }
 0x374   :  { %v746_v39 = vpop.f32.mrf.mxu2  ;;  %870 = vrot.lane.b32.xlu2 %v776_v38, %s1133_s5  ;;  %v1420_v40 = vpack.c.bf16 %v776_v38, %v772_v31 }
 0x375   :  { %v747_v41 = vadd.f32 %v746_v39, %v696_v22  ;;  %v716_v44 = vpop.f32.mrf.mxu0  ;;  %v910_v15 = vld [vmem:[#allocation5 + $0x90] sm:$0xff] }
 0x376   :  { %v845_v45 = vld [vmem:[#allocation4 + $0x38] sm:$0xff]  ;;  %v717_v46 = vadd.f32 %v716_v44, %v691_v42  ;;  %866 = vrot.lane.b32.xlu1 %v1415_v37, %s1133_s5 }
 0x377   :  { %851 = vst.msk [vmem:[#allocation5 + $0xb0] sm:$0xff] %vm169_vm3, %v845_v45  ;;  %v769_v47 = vmul.f32 0.1, %v747_v41 }
 0x378   :  { %v763_v49 = vmul.f32 0.1, %v717_v46 }
 0x379   :  { %v1425_v48 = vmax.f32 %v747_v41, %v769_v47 }
 0x37a   :  { %v1427_v50 = vmax.f32 %v717_v46, %v763_v49  ;;  %v898_v62 = vld [vmem:[#allocation5 + $0x10] sm:$0xff] }
 0x37b   :  { %v927_v51 = vpack.c.bf16 %v1425_v48, %v1415_v37  ;;  %798 = vst.msk [vmem:[#allocation5 + $0x30] sm:$0xff] %vm169_vm3, %v1425_v48 }
 0x37c   :  { %874 = vrot.lane.b32.xlu2 %v845_v45, %s1133_s5  ;;  %811 = vrot.lane.b32.xlu0 %v1427_v50, %s1133_s5 }
 0x37d   :  { %v718_v52 = vpop.f32.mrf.mxu0 }
 0x37e   :  { %v719_v54 = vadd.f32 %v718_v52, %v696_v22  ;;  %815 = vrot.lane.b32.xlu1 %v1415_v37, %s1133_s5  ;;  %v913_v14 = vld [vmem:[#allocation5 + $0xb0] sm:$0xff] }
 0x37f   :  { %v928_v17 = vpack.c.bf16 %v913_v14, %v910_v15 }
 0x380   :  { %v767_v55 = vmul.f32 0.1, %v719_v54 }
 0x382   :  { %v1438_v57 = vmax.f32 %v719_v54, %v767_v55  ;;  %v901_v56 = vld [vmem:[#allocation5 + $0x30] sm:$0xff] }
 0x383   :  { %v922_v16 = vpack.c.bf16 %v901_v56, %v898_v62 }
 0x384   :  { %821 = vrot.lane.b32.xlu2 %v1425_v48, %s1133_s5  ;;  %864 = vrot.lane.b32.xlu0 %v772_v31, %s1133_s5  ;;  %v920_v58 = vpack.c.bf16 %v1438_v57, %v1427_v50 }
 0x386   :  { %813 = vrot.lane.b32.xlu1 %v772_v31, %s1133_s5 }
 0x38c   :  { %817 = vrot.lane.b32.xlu2 %v1438_v57, %s1133_s5  ;;  %872 = vrot.lane.b32.xlu0 %v1425_v48, %s1133_s5 }
 0x38e   :  { %938 = vperm.xlu1 %1119, %v932_v59  }
 0x394   :  { %943 = vperm.xlu2 %1120, %v933_v60   ;;  %819 = vrot.lane.b32.xlu0 %v776_v38, %s1133_s5 }
 0x396   :  { %953 = vperm.xlu1 %1119, %v935_v61  }
 0x39c   :  { %948 = vperm.xlu0 %1121, %v934_v63  }
 0x3ce   :  { %v871_v0 = vpop.permute.xlu2 %870 }
 0x3d6   :  { %v875_v1 = vpop.permute.xlu2 %874 }
 0x3d7   :  { %891 = vst.msk [vmem:[#allocation5 + $0xf0] sm:$0xff] %vm169_vm3, %v875_v1 }
 0x3de   :  { %v822_v2 = vpop.permute.xlu2 %821  ;;  %v919_v8 = vld [vmem:[#allocation5 + $0xf0] sm:$0xff] }
 0x3df   :  { %839 = vst.msk [vmem:[#allocation5 + $0x70] sm:$0xff] %vm169_vm3, %v822_v2 }
 0x3e0   :  { %v869_v5 = vpop.permute.xlu1 %868 }
 0x3e1   :  { %888 = vst.msk [vmem:[#allocation5 + $0xd0] sm:$0xff] %vm169_vm3, %v869_v5 }
 0x3e6   :  { %v907_v53 = vld [vmem:[#allocation5 + $0x70] sm:$0xff]  ;;  %v818_v29 = vpop.permute.xlu2 %817 }
 0x3e8   :  { %v916_v6 = vld [vmem:[#allocation5 + $0xd0] sm:$0xff]  ;;  %v867_v9 = vpop.permute.xlu1 %866 }
 0x3e9   :  { %v931_v10 = vpack.c.bf16 %v919_v8, %v916_v6  ;;  %v877_v12 = vsel %vm823_vm14, %v867_v9, %v869_v5 }
 0x3eb   :  { %1014 = vmatpush.bf16.msrb.mxu2 %v931_v10 }
 0x3ee   :  { %v812_v43 = vpop.permute.xlu0 %811  ;;  %v944_v38 = vpop.permute.xlu2 %943 }
 0x3ef   :  { %1015 = vmatpush.bf16.msrb.mxu2 %v928_v17 }
 0x3f0   :  { %v816_v18 = vpop.permute.xlu1 %815 }
 0x3f1   :  { %836 = vst.msk [vmem:[#allocation5 + $0x50] sm:$0xff] %vm169_vm3, %v816_v18 }
 0x3f6   :  { %v865_v19 = vpop.permute.xlu0 %864 }
 0x3f7   :  { %v876_v23 = vsel %vm823_vm14, %v865_v19, %v867_v9 }
 0x3f8   :  { %v814_v20 = vpop.permute.xlu1 %813  ;;  %v904_v24 = vld [vmem:[#allocation5 + $0x50] sm:$0xff] }
 0x3f9   :  { %v824_v4 = vsel %vm823_vm14, %v812_v43, %v814_v20  ;;  %v825_v7 = vsel %vm823_vm14, %v814_v20, %v816_v18  ;;  %v925_v42 = vpack.c.bf16 %v907_v53, %v904_v24 }
 0x3fb   :  { %1016 = vmatpush.bf16.msrb.mxu2 %v925_v42 }
 0x3fe   :  { %v873_v25 = vpop.permute.xlu0 %872 }
 0x3ff   :  { %1017 = vmatpush.bf16.msrb.mxu2 %v922_v16  ;;  %v878_v26 = vsel %vm823_vm14, %v871_v0, %v873_v25  ;;  %v879_v22 = vsel %vm823_vm14, %v873_v25, %v875_v1 }
 0x400   :  { %v929_v27 = vpack.c.bf16 %v878_v26, %v876_v23  ;;  %v930_v28 = vpack.c.bf16 %v879_v22, %v877_v12  ;;  %v939_v33 = vpop.permute.xlu1 %938 }
 0x402   :  { %1101 = vmatmul.msk.bf16.vlgmr.msrb.gmra.mxu2 %vm703_vm13, %v1105_v21  ;;  %976 = vmatpush.bf16.msra.mxu0 %v929_v27 }
 0x403   :  { %995 = vmatpush.bf16.msrb.mxu1 %v930_v28 }
 0x406   :  { %v820_v30 = vpop.permute.xlu0 %819  ;;  %977 = vmatpush.bf16.msra.mxu0 %v1420_v40 }
 0x407   :  { %v826_v31 = vsel %vm823_vm14, %v818_v29, %v820_v30  ;;  %v827_v32 = vsel %vm823_vm14, %v820_v30, %v822_v2  ;;  %996 = vmatpush.bf16.msrb.mxu1 %v927_v51 }
 0x408   :  { %v923_v3 = vpack.c.bf16 %v826_v31, %v824_v4  ;;  %v924_v11 = vpack.c.bf16 %v827_v32, %v825_v7  ;;  %v954_v8 = vpop.permute.xlu1 %953 }
 0x40a   :  { %978 = vmatpush.bf16.msra.mxu0 %v923_v3 }
 0x40b   :  { %997 = vmatpush.bf16.msrb.mxu1 %v924_v11 }
 0x40e   :  { %979 = vmatpush.bf16.msra.mxu0 %v920_v58  ;;  %v949_v54 = vpop.permute.xlu0 %948 }
 0x40f   :  { %998 = vmatpush.bf16.msrb.mxu1 %v1420_v40 }
 0x411   :  { %1097 = vmatmul.msk.bf16.vlgmr.msra.gmra.mxu0 %vm703_vm13, %v1105_v21 }
 0x412   :  { %1102 = vmatmul.msk.bf16.gmra.mxu2 %vm703_vm13, %v1106_v13  ;;  %1099 = vmatmul.msk.bf16.vlgmr.msrb.gmra.mxu1 %vm703_vm13, %v1105_v21 }
 0x421   :  { %1098 = vmatmul.msk.bf16.gmra.mxu0 %vm703_vm13, %v1106_v13 }
 0x422   :  { %1100 = vmatmul.msk.bf16.gmra.mxu1 %vm703_vm13, %v1106_v13 }
 0x485   :  { %v1019_v34 = vpop.f32.mrf.mxu2 }
 0x486   :  { %v1020_v35 = vadd.f32 %v1019_v34, %v939_v33 }
 0x488   :  { %v1031_v36 = vmul.f32 0.1, %v1020_v35 }
 0x48a   :  { %v1043_v37 = vmax.f32 %v1020_v35, %v1031_v36 }
 0x48c   :  { %1055 = vst.msk [vmem:[%s1544_s9 + $0x10] sm:$0xff] %vm169_vm3, %v1043_v37 }
 0x48d   :  { %v1021_v39 = vpop.f32.mrf.mxu2 }
 0x48e   :  { %v1022_v40 = vadd.f32 %v1021_v39, %v944_v38  ;;  %v981_v41 = vpop.f32.mrf.mxu0 }
 0x48f   :  { %v982_v44 = vadd.f32 %v981_v41, %v939_v33  ;;  %v1000_v45 = vpop.f32.mrf.mxu1 }
 0x490   :  { %v1034_v46 = vmul.f32 0.1, %v1022_v40  ;;  %v1001_v47 = vadd.f32 %v1000_v45, %v939_v33 }
 0x491   :  { %v1029_v49 = vmul.f32 0.1, %v982_v44 }
 0x492   :  { %v1046_v48 = vmax.f32 %v1022_v40, %v1034_v46  ;;  %v1030_v50 = vmul.f32 0.1, %v1001_v47 }
 0x493   :  { %v1041_v51 = vmax.f32 %v982_v44, %v1029_v49 }
 0x494   :  { %1058 = vst.msk [vmem:[%s1544_s9 + $0x28] sm:$0xff] %vm169_vm3, %v1046_v48  ;;  %v1042_v52 = vmax.f32 %v1001_v47, %v1030_v50 }
 0x495   :  { %v1024_v55 = vpop.f32.mrf.mxu2  ;;  %1053 = vst [vmem:[%s1544_s9] sm:$0xff] %v1041_v51 }
 0x496   :  { %v1025_v57 = vadd.f32 %v1024_v55, %v949_v54  ;;  %1054 = vst [vmem:[%s1544_s9 + $0x8] sm:$0xff] %v1042_v52  ;;  %v983_v58 = vpop.f32.mrf.mxu0 }
 0x497   :  { %v984_v59 = vadd.f32 %v983_v58, %v944_v38  ;;  %v1002_v60 = vpop.f32.mrf.mxu1 }
 0x498   :  { %v1037_v61 = vmul.f32 0.1, %v1025_v57  ;;  %v1003_v63 = vadd.f32 %v1002_v60, %v944_v38 }
 0x499   :  { %v1032_v0 = vmul.f32 0.1, %v984_v59 }
 0x49a   :  { %v1049_v1 = vmax.f32 %v1025_v57, %v1037_v61  ;;  %v1033_v2 = vmul.f32 0.1, %v1003_v63 }
 0x49b   :  { %v1044_v5 = vmax.f32 %v984_v59, %v1032_v0 }
 0x49c   :  { %1061 = vst.msk [vmem:[%s1544_s9 + $0x40] sm:$0xff] %vm169_vm3, %v1049_v1  ;;  %v1045_v6 = vmax.f32 %v1003_v63, %v1033_v2 }
 0x49d   :  { %v1026_v9 = vpop.f32.mrf.mxu2  ;;  %1056 = vst [vmem:[%s1544_s9 + $0x18] sm:$0xff] %v1044_v5 }
 0x49e   :  { %v1027_v10 = vadd.f32 %v1026_v9, %v954_v8  ;;  %1057 = vst [vmem:[%s1544_s9 + $0x20] sm:$0xff] %v1045_v6  ;;  %v986_v12 = vpop.f32.mrf.mxu0 }
 0x49f   :  { %v987_v14 = vadd.f32 %v986_v12, %v949_v54  ;;  %v1005_v15 = vpop.f32.mrf.mxu1 }
 0x4a0   :  { %v1040_v17 = vmul.f32 0.1, %v1027_v10  ;;  %v1006_v43 = vadd.f32 %v1005_v15, %v949_v54 }
 0x4a1   :  { %v1035_v18 = vmul.f32 0.1, %v987_v14 }
 0x4a2   :  { %v1052_v19 = vmax.f32 %v1027_v10, %v1040_v17  ;;  %v1036_v23 = vmul.f32 0.1, %v1006_v43 }
 0x4a3   :  { %v1047_v20 = vmax.f32 %v987_v14, %v1035_v18 }
 0x4a4   :  { %1064 = vst.msk [vmem:[%s1544_s9 + $0x58] sm:$0xff] %vm169_vm3, %v1052_v19  ;;  %v1048_v24 = vmax.f32 %v1006_v43, %v1036_v23 }
 0x4a5   :  { %1059 = vst [vmem:[%s1544_s9 + $0x30] sm:$0xff] %v1047_v20 }
 0x4a6   :  { %1060 = vst [vmem:[%s1544_s9 + $0x38] sm:$0xff] %v1048_v24  ;;  %v988_v53 = vpop.f32.mrf.mxu0 }
 0x4a7   :  { %v989_v4 = vadd.f32 %v988_v53, %v954_v8  ;;  %v1007_v7 = vpop.f32.mrf.mxu1 }
 0x4a8   :  { %v1008_v42 = vadd.f32 %v1007_v7, %v954_v8 }
 0x4a9   :  { %v1038_v56 = vmul.f32 0.1, %v989_v4 }
 0x4aa   :  { %v1039_v62 = vmul.f32 0.1, %v1008_v42 }
 0x4ab   :  { %v1050_v16 = vmax.f32 %v989_v4, %v1038_v56 }
 0x4ac   :  { %v1051_v21 = vmax.f32 %v1008_v42, %v1039_v62 }
 0x4ad   :  { %1062 = vst [vmem:[%s1544_s9 + $0x48] sm:$0xff] %v1050_v16 }
 0x4ae   :  { %1063 = vst [vmem:[%s1544_s9 + $0x50] sm:$0xff] %v1051_v21 }

</bundles_post_ra>
